<compile_context>
chip_gen: v7x
topology: tpu7x:2x2x1
jax: 0.10.0
libtpu: 0.0.40
codegen_flags: <defaults>
</compile_context>

<pallas_src>
import jax
import jax.numpy as jnp
from jax.experimental import pallas as pl
from jax.experimental.pallas import tpu as pltpu


# ----------------------------------------------------------------------------
# Kernel body
# ----------------------------------------------------------------------------
def _generator_kernel(x_ref, w_ref, b_ref, o_ref, acc_ref):
    # x_ref: (tm, tk) bf16, w_ref: (tk, tn) bf16, b_ref: (1, tn) f32,
    # o_ref: (tm, tn) out dtype, acc_ref: (tm, tn) f32 scratch (lives across k).
    k = pl.program_id(2)
    partial = jnp.dot(x_ref[...], w_ref[...], preferred_element_type=jnp.float32)

    # Fold bias + accumulator init into the first K step: saves a full-tile
    # zero-fill and a full-tile add per output tile.
    @pl.when(k == 0)
    def _():
        acc_ref[...] = partial + b_ref[...]

    @pl.when(k > 0)
    def _():
        acc_ref[...] += partial

    @pl.when(k == pl.num_programs(2) - 1)
    def _():
        o_ref[...] = acc_ref[...].astype(o_ref.dtype)


# ----------------------------------------------------------------------------
# Tiling helpers
# ----------------------------------------------------------------------------
def _round_up(x, m):
    return ((x + m - 1) // m) * m


def _chip_generation():
    try:
        kind = jax.devices()[0].device_kind.lower()
    except Exception:
        return 6
    for gen in (7, 6, 5, 4):
        if "v%d" % gen in kind:
            return gen
    return 6


def _largest_divisor_tile(dim, cap, align):
    """Largest multiple of `align` <= cap that divides `dim` (0 if none)."""
    best = 0
    limit = min(dim, cap)
    t = align
    while t <= limit:
        if dim % t == 0:
            best = t
        t += align
    return best


def _choose_kn_tiles(K, N, chip_gen):
    # K (reduction) tile.  v5e: bigger K tile -> fewer f32 accumulator
    # read-modify-write passes (single vst slot is the binding slot there).
    full_k = 2048 if chip_gen == 5 else 1024
    if K <= full_k:
        tk = K
    else:
        tk_cap = 1024 if chip_gen == 5 else 512
        tk = _largest_divisor_tile(K, tk_cap, 128) or tk_cap
    # N (vocab / lane) tile: lane-dense, prefer a divisor of N (no weight pad).
    tn_cap = 2048 if chip_gen >= 6 else 1024
    if N <= tn_cap:
        tn = _round_up(N, 128)
    else:
        tn = _largest_divisor_tile(N, tn_cap, 128) or tn_cap
    return tk, tn


def _choose_m_tile(M, chip_gen):
    tm_cap = 1024 if chip_gen >= 6 else 512
    if M >= tm_cap:
        return tm_cap
    # bf16 packs 16 rows per sublane group -> keep the row tile 16-aligned.
    return max(_round_up(M, 16), 16)


# ----------------------------------------------------------------------------
# Parameter preparation (one-time, NOT in the per-call hot path)
# ----------------------------------------------------------------------------
def prepare_generator_params(weight_t, bias, *, chip_gen=None):
    """Cast the LM-head weight to bf16 and pad it to the tile grid, once.

    weight_t: [d_model, d_vocab] (transpose of torch nn.Linear weight)
    bias:     [d_vocab]
    Returns a dict consumed by generator_forward_prepared().
    """
    if chip_gen is None:
        chip_gen = _chip_generation()
    K, N = weight_t.shape
    tk, tn = _choose_kn_tiles(K, N, chip_gen)
    K_pad = _round_up(K, tk)
    N_pad = _round_up(N, tn)

    w = weight_t.astype(jnp.bfloat16)
    b = bias.astype(jnp.float32)
    if K_pad != K or N_pad != N:
        w = jnp.pad(w, ((0, K_pad - K), (0, N_pad - N)))
    if N_pad != N:
        b = jnp.pad(b, (0, N_pad - N))
    return {
        "w_bf16": w,                    # (K_pad, N_pad) bf16
        "b_f32": b.reshape(1, N_pad),   # (1, N_pad) f32
        "d_model": K,
        "d_vocab": N,
        "tk": tk,
        "tn": tn,
        "chip_gen": chip_gen,
    }


# ----------------------------------------------------------------------------
# Forward pass
# ----------------------------------------------------------------------------
def generator_forward_prepared(x, params, *, out_dtype=None):
    """Linear projection y = x @ W + b with pre-prepared weights."""
    chip_gen = params["chip_gen"]
    K = params["d_model"]
    N = params["d_vocab"]
    tk, tn = params["tk"], params["tn"]
    K_pad, N_pad = params["w_bf16"].shape

    if out_dtype is None:
        out_dtype = x.dtype
    out_itemsize = jnp.dtype(out_dtype).itemsize

    orig_shape = x.shape
    assert orig_shape[-1] == K, "x last dim must equal d_model"
    x2d = x.reshape(-1, K)
    M = x2d.shape[0]

    # Row tile (shrunk if the double-buffered footprint would blow VMEM).
    tm = _choose_m_tile(M, chip_gen)

    def vmem_need(tm_):
        return (2 * tm_ * tk * 2                 # x blocks (bf16)
                + 2 * tk * tn * 2                # weight blocks (bf16)
                + 2 * tm_ * tn * out_itemsize    # output blocks
                + 2 * tn * 4                     # bias blocks
                + tm_ * tn * 4)                  # f32 accumulator scratch

    # 64 MiB physical VMEM on v7x -> leave compiler headroom; 128 MiB parts
    # (v5e/v6e) can use ~100 MiB.
    vmem_cap = 56 * 1024 * 1024 if chip_gen >= 7 else 100 * 1024 * 1024
    while vmem_need(tm) > int(0.9 * vmem_cap) and tm > 128:
        tm = max(tm // 2, 128)

    M_pad = _round_up(M, tm)

    # Only x is touched per call: cast to bf16 (half the HBM traffic, native
    # MXU input) and pad if needed.
    x_bf = x2d.astype(jnp.bfloat16)
    if M_pad != M or K_pad != K:
        x_bf = jnp.pad(x_bf, ((0, M_pad - M), (0, K_pad - K)))

    n_i = M_pad // tm   # row tiles
    n_j = N_pad // tn   # vocab tiles
    n_k = K_pad // tk   # reduction tiles

    # Lead with the parallel axis whose tile count is even when possible so
    # the megacore sharding (v7x 2 TCs) stays balanced; default: vocab leads.
    lead_rows = (n_j % 2 == 1) and (n_i % 2 == 0) and (n_i > 1)
    if lead_rows:
        grid = (n_i, n_j, n_k)
        x_map = lambda i, j, k: (i, k)
        w_map = lambda i, j, k: (k, j)
        b_map = lambda i, j, k: (0, j)
        o_map = lambda i, j, k: (i, j)
    else:
        grid = (n_j, n_i, n_k)
        x_map = lambda j, i, k: (i, k)
        w_map = lambda j, i, k: (k, j)
        b_map = lambda j, i, k: (0, j)
        o_map = lambda j, i, k: (i, j)

    vmem_limit = int(min(max(2 * vmem_need(tm), 32 * 1024 * 1024), vmem_cap))

    cost = pl.CostEstimate(
        flops=2 * M_pad * K_pad * N_pad,
        transcendentals=0,
        bytes_accessed=(M_pad * K_pad * 2 * n_j        # x re-streamed per vocab tile
                        + K_pad * N_pad * 2 * n_i      # W re-streamed per row tile
                        + M_pad * N_pad * out_itemsize
                        + N_pad * 4),
    )

    out = pl.pallas_call(
        _generator_kernel,
        out_shape=jax.ShapeDtypeStruct((M_pad, N_pad), out_dtype),
        grid_spec=pltpu.PrefetchScalarGridSpec(
            num_scalar_prefetch=0,
            grid=grid,
            in_specs=[
                pl.BlockSpec((tm, tk), x_map),
                pl.BlockSpec((tk, tn), w_map),
                pl.BlockSpec((1, tn), b_map),
            ],
            out_specs=pl.BlockSpec((tm, tn), o_map),
            scratch_shapes=[pltpu.VMEM((tm, tn), jnp.float32)],
        ),
        compiler_params=pltpu.CompilerParams(
            dimension_semantics=("parallel", "parallel", "arbitrary"),
            vmem_limit_bytes=vmem_limit,
        ),
        cost_estimate=cost,
    )(x_bf, params["w_bf16"], params["b_f32"])

    if M_pad != M or N_pad != N:
        out = out[:M, :N]
    return out.reshape(*orig_shape[:-1], N)


def generator_forward(x, weight_t, bias, *, out_dtype=None):
    """Convenience wrapper (prepares the weight per call -> slow path).

    For repeated calls, prepare once with prepare_generator_params() and use
    generator_forward_prepared().
    """
    params = prepare_generator_params(weight_t, bias)
    return generator_forward_prepared(x, params, out_dtype=out_dtype)


# Extra (non-hot-path) module methods in plain JAX.
# TODO(synk): fuse log_softmax / argmax as an online (running max / log-sum-exp)
# reduction over vocab tiles inside the kernel to remove the [M, d_vocab]
# logits HBM round-trip.
def generator_log_prob(x, params):
    logits = generator_forward_prepared(x, params, out_dtype=jnp.float32)
    return jax.nn.log_softmax(logits, axis=-1)


def generator_predict(x, params):
    return jnp.argmax(generator_forward_prepared(x, params), axis=-1)


def generator_topk(x, params, k):
    return jax.lax.top_k(generator_log_prob(x, params), k)


if __name__ == "__main__":
    key = jax.random.PRNGKey(0)
    batch, seq, d_model, d_vocab = 2, 8, 32, 256

    kx, kw, kb = jax.random.split(key, 3)
    x = jax.random.normal(kx, (batch, seq, d_model), dtype=jnp.float32)
    # Deterministic "nn.Linear(d_model, d_vocab)" parameters.
    bound = 1.0 / jnp.sqrt(d_model)
    weight = jax.random.uniform(kw, (d_vocab, d_model), jnp.float32, -bound, bound)
    bias = jax.random.uniform(kb, (d_vocab,), jnp.float32, -bound, bound)
    weight_t = weight.T  # [d_model, d_vocab]

    # Hot-path usage: prepare weights once, reuse across calls.
    params = prepare_generator_params(weight_t, bias)
    y = generator_forward_prepared(x, params)
    y = jax.block_until_ready(y)
    assert y.shape == (batch, seq, d_vocab)

    # Convenience wrapper path matches the prepared path.
    y2 = jax.block_until_ready(generator_forward(x, weight_t, bias))
    assert jnp.allclose(y, y2), "prepared vs convenience mismatch"

    # Reference 1: same bf16-quantized operands, f32 math (tight tolerance).
    x_q = x.astype(jnp.bfloat16).astype(jnp.float32)
    w_q = weight_t.astype(jnp.bfloat16).astype(jnp.float32)
    y_ref_bf16 = x_q @ w_q + bias
    assert jnp.allclose(y, y_ref_bf16, atol=1e-3, rtol=1e-3), "mismatch vs bf16 ref"

    # Reference 2: full-f32 linear (loose tolerance for bf16 operand quantization).
    y_ref_f32 = x @ weight_t + bias
    assert jnp.allclose(y, y_ref_f32, atol=5e-2, rtol=5e-2), "mismatch vs f32 ref"

    # Auxiliary module methods run.
    pred = jax.block_until_ready(generator_predict(x, params))
    assert pred.shape == (batch, seq)
    lp = jax.block_until_ready(generator_log_prob(x, params))
    assert lp.shape == (batch, seq, d_vocab)
    assert jnp.allclose(jnp.exp(lp).sum(-1), 1.0, atol=1e-3)

    print("KERNEL_OK")
</pallas_src>

<mosaic_0001>
module attributes {stable_mosaic.version = 11 : i64} {
  func.func @_generator_kernel(%arg0: i32, %arg1: i32, %arg2: i32, %arg3: memref<16x32xbf16, #tpu.memory_space<vmem>>, %arg4: memref<32x256xbf16, #tpu.memory_space<vmem>>, %arg5: memref<1x256xf32, #tpu.memory_space<vmem>>, %arg6: memref<16x256xf32, #tpu.memory_space<vmem>>, %arg7: memref<16x256xf32, #tpu.memory_space<vmem>>) attributes {dimension_semantics = [#tpu.dimension_semantics<parallel>, #tpu.dimension_semantics<parallel>, #tpu.dimension_semantics<arbitrary>], iteration_bounds = array<i64: 1, 1, 1>, scalar_prefetch = 0 : i64, scratch_operands = 1 : i64, tpu.core_type = #tpu.core_type<tc>, window_params = [{transform_indices = @transform_0, window_bounds = array<i64: 16, 32>}, {transform_indices = @transform_1, window_bounds = array<i64: 32, 256>}, {transform_indices = @transform_2, window_bounds = array<i64: 1, 256>}, {transform_indices = @transform_3, window_bounds = array<i64: 16, 256>}]} {
    %c0 = arith.constant 0 : index
    %c0_0 = arith.constant 0 : index
    %0 = vector.load %arg3[%c0, %c0_0] : memref<16x32xbf16, #tpu.memory_space<vmem>>, vector<16x32xbf16>
    %c0_1 = arith.constant 0 : index
    %c0_2 = arith.constant 0 : index
    %1 = vector.load %arg4[%c0_1, %c0_2] : memref<32x256xbf16, #tpu.memory_space<vmem>>, vector<32x256xbf16>
    %cst = arith.constant dense<0.000000e+00> : vector<16x256xf32>
    %2 = tpu.matmul %0, %1, %cst {dimension_numbers = #tpu.dot_dimension_numbers<[1], [0], [0], [1], [0, 0, 1, 1], [], []>} : vector<16x32xbf16>, vector<32x256xbf16>, vector<16x256xf32> -> vector<16x256xf32>
    %c0_i32 = arith.constant 0 : i32
    %3 = arith.cmpi eq, %arg2, %c0_i32 : i32
    %4 = arith.extui %3 : i1 to i32
    %c0_i32_3 = arith.constant 0 : i32
    %5 = arith.cmpi ne, %4, %c0_i32_3 : i32
    scf.if %5 {
      %c0_8 = arith.constant 0 : index
      %c0_9 = arith.constant 0 : index
      %12 = vector.load %arg5[%c0_8, %c0_9] : memref<1x256xf32, #tpu.memory_space<vmem>>, vector<1x256xf32>
      %13 = vector.broadcast %12 : vector<1x256xf32> to vector<16x256xf32>
      %14 = arith.addf %2, %13 : vector<16x256xf32>
      %c0_10 = arith.constant 0 : index
      %c0_11 = arith.constant 0 : index
      %15 = vector.load %arg7[%c0_10, %c0_11] : memref<16x256xf32, #tpu.memory_space<vmem>>, vector<16x256xf32>
      tpu.vector_store %arg7[%c0_10, %c0_11], %14 {strides = array<i32>} : memref<16x256xf32, #tpu.memory_space<vmem>>, vector<16x256xf32>,
    } else {
    }
    %c0_i32_4 = arith.constant 0 : i32
    %6 = arith.cmpi sgt, %arg2, %c0_i32_4 : i32
    %7 = arith.extui %6 : i1 to i32
    %c0_i32_5 = arith.constant 0 : i32
    %8 = arith.cmpi ne, %7, %c0_i32_5 : i32
    scf.if %8 {
      %c0_8 = arith.constant 0 : index
      %c0_9 = arith.constant 0 : index
      %12 = vector.load %arg7[%c0_8, %c0_9] : memref<16x256xf32, #tpu.memory_space<vmem>>, vector<16x256xf32>
      %13 = arith.addf %12, %2 : vector<16x256xf32>
      %c0_10 = arith.constant 0 : index
      %c0_11 = arith.constant 0 : index
      %14 = vector.load %arg7[%c0_10, %c0_11] : memref<16x256xf32, #tpu.memory_space<vmem>>, vector<16x256xf32>
      tpu.vector_store %arg7[%c0_10, %c0_11], %13 {strides = array<i32>} : memref<16x256xf32, #tpu.memory_space<vmem>>, vector<16x256xf32>,
    } else {
    }
    %c0_i32_6 = arith.constant 0 : i32
    %9 = arith.cmpi eq, %arg2, %c0_i32_6 : i32
    %10 = arith.extui %9 : i1 to i32
    %c0_i32_7 = arith.constant 0 : i32
    %11 = arith.cmpi ne, %10, %c0_i32_7 : i32
    scf.if %11 {
      %c0_8 = arith.constant 0 : index
      %c0_9 = arith.constant 0 : index
      %12 = vector.load %arg7[%c0_8, %c0_9] : memref<16x256xf32, #tpu.memory_space<vmem>>, vector<16x256xf32>
      %c0_10 = arith.constant 0 : index
      %c0_11 = arith.constant 0 : index
      %13 = vector.load %arg6[%c0_10, %c0_11] : memref<16x256xf32, #tpu.memory_space<vmem>>, vector<16x256xf32>
      tpu.vector_store %arg6[%c0_10, %c0_11], %12 {strides = array<i32>} : memref<16x256xf32, #tpu.memory_space<vmem>>, vector<16x256xf32>,
    } else {
    }
    return
  }
  func.func @transform_0(%arg0: i32, %arg1: i32, %arg2: i32) -> (i32, i32) {
    %c0_i32 = arith.constant 0 : i32
    return %arg1, %arg2 : i32, i32
  }
  func.func @transform_1(%arg0: i32, %arg1: i32, %arg2: i32) -> (i32, i32) {
    %c0_i32 = arith.constant 0 : i32
    return %arg2, %arg0 : i32, i32
  }
  func.func @transform_2(%arg0: i32, %arg1: i32, %arg2: i32) -> (i32, i32) {
    %c0_i32 = arith.constant 0 : i32
    %c0_i32_0 = arith.constant 0 : i32
    return %c0_i32, %arg0 : i32, i32
  }
  func.func @transform_3(%arg0: i32, %arg1: i32, %arg2: i32) -> (i32, i32) {
    %c0_i32 = arith.constant 0 : i32
    return %arg1, %arg0 : i32, i32
  }
}

</mosaic_0001>

<bundles_post_ra>
// kernel: tpu_custom_call.1
= control target key start
LH: loop header
LB: loop body
LE: loop exit
PB: predicated region body
PF: predicated region fallthrough
CT: control target
= control target key end

     0   :  { %8 = vsyncpa [#allocation4], 0  ;;  %s355_s0 = inlined_call_operand.hbm [shape: bf16[16,32], index: 0, kind: input, shape index: {}]   ;;  %s356_s1 = inlined_call_operand.hbm [shape: bf16[32,256], index: 1, kind: input, shape index: {}]   ;;  %s357_s2 = inlined_call_operand.vmem [shape: f32[1,256], index: 2, kind: input, shape index: {}]   ;;  %s358_s3 = inlined_call_operand.hbm [shape: f32[16,256], index: 3, kind: output, shape index: {}]  }
   0x1   :  { %9 = vsyncpa [#allocation7], 0 }
   0x2   :  { %10 = vsyncpa [#allocation5], 0  ;;  %s286_s12 = smov [#allocation3]   ;;  %s214_s16 = scalar_lea.hbm %s355_s0, 128 }
   0x3   :  { %s16_s13 = sshll.u32 %s286_s12, 4  ;;  %p215_p0 = scmp.ne.s32.totalorder %s355_s0, %s214_s16  ;;  %s17_s13 = int_to_ptr.vmem [resolvable:$true] %s16_s13 }
   0x4   :  { %p218_p1 = scmp.lt.u32.totalorder %s214_s16, %s355_s0 }
   0x6   :  { %p220_p2 = pnand %p218_p1, %p215_p0 }
   0x8   :  { %223 = shalt.err (!%p220_p2)
}
   0x9   :  { %s224_s21 = scalar_lea.vmem %s17_s13, 128  ;;  %p229_p4 = scmp.lt.s32.totalorder %s17_s13, %s17_s13 }
   0xa   :  { %p225_p3 = scmp.ne.s32.totalorder %s17_s13, %s224_s21  ;;  %p230_p5 = scmp.lt.s32.totalorder %s224_s21, %s224_s21 }
   0xc   :  { %p231_p6 = por %p230_p5, %p229_p4 }
   0xe   :  { %p232_p7 = pnand %p231_p6, %p225_p3 }
  0x10   :  { %235 = shalt.err (!%p232_p7)
}
  0x11   :  { %s287_s22 = smov 64   ;;  %s288_s23 = smov 4  }
  0x12   :  { %22 = dma.hbm_to_vmem [thread:$0]  %s355_s0, 128, %s17_s13, [#allocation4], %s287_s22, %s287_s22, %s288_s23  }
  0x13   :  { %s289_s26 = smov [#allocation6]   ;;  %s236_s30 = scalar_lea.hbm %s356_s1, 512 }
  0x14   :  { %s28_s27 = sshll.u32 %s289_s26, 4  ;;  %p237_p8 = scmp.ne.s32.totalorder %s356_s1, %s236_s30  ;;  %s29_s27 = int_to_ptr.vmem [resolvable:$true] %s28_s27 }
  0x15   :  { %p240_p9 = scmp.lt.u32.totalorder %s236_s30, %s356_s1 }
  0x17   :  { %p242_p10 = pnand %p240_p9, %p237_p8 }
  0x19   :  { %245 = shalt.err (!%p242_p10)
}
  0x1a   :  { %s246_s8 = scalar_lea.vmem %s29_s27, 512  ;;  %p251_p12 = scmp.lt.s32.totalorder %s29_s27, %s29_s27 }
  0x1b   :  { %p247_p11 = scmp.ne.s32.totalorder %s29_s27, %s246_s8  ;;  %p252_p13 = scmp.lt.s32.totalorder %s246_s8, %s246_s8 }
  0x1d   :  { %p253_p0 = por %p252_p13, %p251_p12 }
  0x1f   :  { %p254_p1 = pnand %p253_p0, %p247_p11 }
  0x21   :  { %257 = shalt.err (!%p254_p1)
}
  0x22   :  { %s290_s0 = smov 128   ;;  %s291_s9 = smov 8  }
  0x23   :  { %34 = dma.hbm_to_vmem [thread:$0]  %s356_s1, 512, %s29_s27, [#allocation7], %s290_s0, %s290_s0, %s291_s9  }
  0x24   :  { %280 = dma.done.wait [#allocation4], 128  }
  0x25   :  { %281 = vsyncadd [#allocation4], 4294967168 }
  0x26   :  { %282 = dma.done.wait [#allocation7], 512  }
  0x27   :  { %283 = vsyncadd [#allocation7], 4294966784  ;;  %v292_v0 = vmov 0   ;;  %v207_v1 = vld [vmem:[#allocation6 + $0x4] ss:$8 sps:$4 sm:$0xff]   ;;  %v213_v5 = vld [vmem:[#allocation3] sm:$0xff]   ;;  %v128_v6 = vlaneseq }
  0x28   :  { %111 = vmatprep.mubr.bf16.mxu0 %v292_v0  ;;  %v209_v2 = vld [vmem:[#allocation6] ss:$8 sps:$4 sm:$0xff]   ;;  %79 = vmatprep.subr.bf16.mxu0 %v207_v1  ;;  %v210_v3 = vld [vmem:[#allocation6 + $0x14] ss:$8 sps:$4 sm:$0xff]   ;;  %v212_v4 = vld [vmem:[#allocation6 + $0x10] ss:$8 sps:$4 sm:$0xff]  }
  0x29   :  { %80 = vmatpush1.bf16.msra.mxu0 %v209_v2  ;;  %vm75_vm0 = vcmask 261120   ;;  %v129_v7 = vshrl.u32 %v128_v6, 7  ;;  %v126_v9 = vld [vmem:[%s357_s2] sm:$0x3]  ;;  %s293_s13 = smov [#allocation8]  }
  0x2a   :  { %81 = vmatprep.subr.bf16.mxu0 %v210_v3  ;;  %s178_s14 = sshll.u32 %s293_s13, 4  ;;  %s179_s14 = int_to_ptr.vmem [resolvable:$true] %s178_s14 }
  0x2b   :  { %v130_v8 = vsub.s32 0, %v129_v7  ;;  %v134_v10 = vsub.s32 1, %v129_v7  ;;  %s258_s15 = scalar_lea.vmem %s179_s14, 512  ;;  %p263_p3 = scmp.lt.s32.totalorder %s179_s14, %s179_s14 }
  0x2c   :  { %p259_p2 = scmp.ne.s32.totalorder %s179_s14, %s258_s15  ;;  %p264_p4 = scmp.lt.s32.totalorder %s258_s15, %s258_s15 }
  0x2d   :  { %82 = vmatpush1.bf16.msra.mxu0 %v212_v4  ;;  %v131_v11 = vrot.slane %v126_v9, %v130_v8  ;;  %v135_v12 = vrot.slane %v126_v9, %v134_v10 }
  0x2e   :  { %p265_p5 = por %p264_p4, %p263_p3 }
  0x30   :  { %196 = vmatmul.mubr.msk.bf16.vlgmr.msra.gmra.mrb[0].mxu0 %vm75_vm0, %v213_v5  ;;  %p266_p6 = pnand %p265_p5, %p259_p2 }
 0x103   :  { %v113_v13 = vpop.f32.mrb[0].mxu0 }
 0x104   :  { %v138_v14 = vadd.f32 %v131_v11, %v113_v13  ;;  %v115_v15 = vpop.f32.mrb[1].mxu0 }
 0x105   :  { %v139_v16 = vadd.f32 %v135_v12, %v115_v15  ;;  %v117_v17 = vpop.f32.mrb[2].mxu0 }
 0x106   :  { %169 = vst [vmem:[#allocation8] sm:$0xff] %v138_v14  ;;  %v140_v18 = vadd.f32 %v131_v11, %v117_v17  ;;  %v119_v19 = vpop.f32.mrb[3].mxu0 }
 0x107   :  { %170 = vst [vmem:[#allocation8 + $0x8] sm:$0xff] %v139_v16  ;;  %v141_v20 = vadd.f32 %v135_v12, %v119_v19 }
 0x108   :  { %171 = vst [vmem:[#allocation8 + $0x10] sm:$0xff] %v140_v18 }
 0x109   :  { %172 = vst [vmem:[#allocation8 + $0x18] sm:$0xff] %v141_v20 }
 0x10a   :  { %269 = shalt.err (!%p266_p6)
}
 0x10b   :  { %s270_s17 = scalar_lea.hbm %s358_s3, 512 }
 0x10c   :  { %p271_p7 = scmp.ne.s32.totalorder %s358_s3, %s270_s17  ;;  %p274_p8 = scmp.lt.u32.totalorder %s270_s17, %s358_s3 }
 0x10e   :  { %p276_p9 = pnand %p274_p8, %p271_p7 }
 0x110   :  { %279 = shalt.err (!%p276_p9)
}
 0x111   :  { %s294_s22 = smov 256   ;;  %s295_s23 = smov 16  }
 0x112   :  { %184 = dma.vmem_to_hbm [thread:$0]  %s179_s14, 512, %s358_s3, [#allocation5], %s294_s22, %s294_s22, %s295_s23  }
 0x113   :  { %284 = dma.done.wait [#allocation5], 512  }
 0x114   :  { %285 = vsyncadd [#allocation5], 4294966784 }
 0x115   :  { %188 = vsyncpa [#allocation4], 1 }
 0x116   :  { %189 = vsyncpa [#allocation7], 1 }
 0x117   :  { %190 = vsyncpa [#allocation5], 1 }

</bundles_post_ra>
